<compile_context>
chip_gen: v7x
topology: tpu7x:2x2x1
jax: 0.10.0
libtpu: 0.0.40
codegen_flags: <defaults>
</compile_context>

<pallas_src>
import functools

import jax
import jax.numpy as jnp
from jax import lax
from jax.experimental import pallas as pl
from jax.experimental.pallas import tpu as pltpu


def _round_up(x, m):
    return (x + m - 1) // m * m


def _vmem_budget_bytes():
    """Generation-aware usable-VMEM budget (leaves ~22% compiler headroom)."""
    try:
        cap = int(pltpu.get_tpu_info().vmem_capacity_bytes)
    except Exception:
        cap = 0
    if cap <= 0:
        cap = 64 * 1024 * 1024          # conservative fallback (v7x per-TC VMEM)
    # v7x (64 MiB) -> ~50 MiB; v5e/v6e (128 MiB) -> ~100 MiB.
    return int(cap * 0.78)


def _footprint_bytes(B, t_pad, block_t, H, H2, stream_itemsize, enc_buffers):
    """Estimated VMEM footprint incl. double-buffered resident operands and
    (8, 128) sublane/lane padding."""
    lane = lambda x: _round_up(max(x, 1), 128)
    sub = lambda x: _round_up(max(x, 1), 8)
    fixed = (2 * sub(B) * lane(H) * 4                      # hidden
             + 2 * sub(H) * lane(H) * 4                    # Wh
             + 2 * sub(H2) * lane(H) * stream_itemsize     # We
             + 2 * sub(1) * lane(H) * 4                    # bias
             + 2 * sub(H) * lane(1) * 4                    # v (H, 1)
             + 2 * sub(t_pad) * lane(B) * 4                # resident (T_pad, B) output
             + sub(B) * lane(H) * 4                        # hproj scratch
             + (2 << 20))                                  # compiler-internal headroom
    stream = enc_buffers * B * sub(block_t) * lane(H2) * stream_itemsize
    return fixed + stream


def _choose_block_t(B, T, H, H2, stream_itemsize, enc_buffers, budget):
    """Largest lane-aligned block_t whose streamed+resident footprint fits."""
    t_min_pad = _round_up(max(T, 1), 128)
    candidates = sorted({c for c in (128, 256, 512, 1024, 2048, 4096, t_min_pad)
                         if c <= t_min_pad})
    block_t = 128
    for bt in reversed(candidates):
        t_pad = _round_up(T, bt)
        if _footprint_bytes(B, t_pad, bt, H, H2, stream_itemsize, enc_buffers) <= budget:
            block_t = bt
            break
    return block_t


def _attention_kernel(h_ref, enc_ref, wh_ref, we_ref, bias_ref, v_ref,
                      out_ref, hproj_ref, *, valid_t):
    t = pl.program_id(0)
    num_t = pl.num_programs(0)
    B, block_t, H2 = enc_ref.shape
    t_pad = out_ref.shape[0]

    # hidden @ Wh + bias: computed once, reused by every T block.
    @pl.when(t == 0)
    def _():
        hproj_ref[...] = (
            jnp.dot(h_ref[...], wh_ref[...], preferred_element_type=jnp.float32)
            + bias_ref[...])

    # One fused MXU matmul for the whole (B, block_t) enc tile.  Merging the
    # leading dims is layout-preserving (block_t is a multiple of 128).
    enc2d = enc_ref[...].reshape(B * block_t, H2)
    eproj = jnp.dot(enc2d, we_ref[...],
                    preferred_element_type=jnp.float32)          # (B*block_t, H), f32

    v_col = v_ref[...]                                           # (H, 1), resident
    row0 = pl.multiple_of(t * block_t, 128)

    # Per-batch add/tanh/score.  The score is an MXU (block_t, H) @ (H, 1) dot,
    # so no XLU lane-reduce / relayout happens inside the grid loop.  B is
    # small here; large B/H configs should switch to a fori_loop to bound
    # eproj/energy live ranges.
    cols = []
    for b in range(B):
        eproj_b = eproj[b * block_t:(b + 1) * block_t, :]        # static, tile-aligned
        energy = jnp.tanh(eproj_b + hproj_ref[pl.ds(b, 1), :])   # (block_t, H)
        cols.append(jnp.dot(energy, v_col,
                            preferred_element_type=jnp.float32))  # (block_t, 1)
    # Single (block_t, B) store per grid step into the column-layout output.
    out_ref[pl.ds(row0, block_t), :] = jnp.concatenate(cols, axis=1)

    # Finalize once: masked softmax over the T (sublane) axis of the resident
    # (T_pad, B) buffer.  This is the only cross-sublane work in the kernel.
    @pl.when(t == num_t - 1)
    def _():
        s = out_ref[...]                                         # (t_pad, B)
        if valid_t < t_pad:   # static Python condition
            row = lax.broadcasted_iota(jnp.int32, (t_pad, B), 0)
            s = jnp.where(row < valid_t, s, -jnp.inf)
        m = jnp.max(s, axis=0, keepdims=True)                    # (1, B)
        e = jnp.exp(s - m)
        out_ref[...] = e / jnp.sum(e, axis=0, keepdims=True)


def attention_forward(hidden, encoder_outputs, Wh, We, bias, v,
                      *, block_t=None, stream_dtype="auto", enc_buffers=2):
    """softmax_T( v . tanh(hidden @ Wh + enc @ We + bias) ) as one Pallas kernel.

    v must be a column vector of shape (H, 1).
    stream_dtype: dtype of the big streamed operands (encoder_outputs, We).
      "auto" -> bfloat16 (kernel is HBM-bound on the enc stream; accumulation
      stays f32 on the MXU, so this is safe on v5e as well).  None -> no cast.
    enc_buffers: pipeline depth for the enc stream (use 3 if profiling shows
      exposed DMA; costs one extra enc tile of VMEM).
    """
    B, T, H2 = encoder_outputs.shape
    H = Wh.shape[0]
    assert H2 == 2 * H and Wh.shape == (H, H) and We.shape == (H2, H)
    assert bias.shape == (1, H) and v.shape == (H, 1)

    if isinstance(stream_dtype, str) and stream_dtype == "auto":
        stream_dtype = jnp.bfloat16
    enc = encoder_outputs
    We_s = We
    if stream_dtype is not None and jnp.dtype(stream_dtype) != enc.dtype:
        enc = enc.astype(stream_dtype)
        We_s = We.astype(stream_dtype)

    itemsize = jnp.dtype(enc.dtype).itemsize
    budget = _vmem_budget_bytes()
    if block_t is None:
        block_t = _choose_block_t(B, T, H, H2, itemsize, enc_buffers, budget)
    else:
        block_t = _round_up(block_t, 128)
    t_pad = _round_up(T, block_t)
    num_t = t_pad // block_t
    if t_pad != T:
        enc = jnp.pad(enc, ((0, 0), (0, t_pad - T), (0, 0)))

    vmem_need = _footprint_bytes(B, t_pad, block_t, H, H2, itemsize, enc_buffers)
    vmem_limit = int(max(budget, vmem_need))

    enc_spec_kw = {} if enc_buffers == 2 else {"pipeline_mode": pl.Buffered(enc_buffers)}

    grid_spec = pltpu.PrefetchScalarGridSpec(
        num_scalar_prefetch=0,
        grid=(num_t,),
        in_specs=[
            pl.BlockSpec((B, H), lambda t: (0, 0)),                # hidden (resident)
            pl.BlockSpec((B, block_t, H2), lambda t: (0, t, 0),    # enc    (streamed over T)
                         **enc_spec_kw),
            pl.BlockSpec((H, H), lambda t: (0, 0)),                # Wh     (resident)
            pl.BlockSpec((H2, H), lambda t: (0, 0)),               # We     (resident)
            pl.BlockSpec((1, H), lambda t: (0, 0)),                # bias   (resident)
            pl.BlockSpec((H, 1), lambda t: (0, 0)),                # v      (resident)
        ],
        # Resident column-layout score/softmax buffer (T on sublanes, B on lanes).
        out_specs=pl.BlockSpec((t_pad, B), lambda t: (0, 0)),
        scratch_shapes=[pltpu.VMEM((B, H), jnp.float32)],          # hproj = hidden@Wh + bias
    )

    kernel = functools.partial(_attention_kernel, valid_t=T)

    out = pl.pallas_call(
        kernel,
        out_shape=jax.ShapeDtypeStruct((t_pad, B), jnp.float32),
        grid_spec=grid_spec,
        compiler_params=pltpu.CompilerParams(
            # The T axis carries the resident output + softmax finalization.
            dimension_semantics=("arbitrary",),
            vmem_limit_bytes=vmem_limit,
        ),
    )(hidden, enc, Wh, We_s, bias, v)
    # Tiny (T, B) -> (B, T) transpose in the wrapper (plain XLA op).
    return jnp.transpose(out[:T, :])


def attention_reference(hidden, encoder_outputs, Wh, We, bias, v):
    # Pure-JAX mirror of the PyTorch forward (for verification). v: (H, 1).
    hproj = hidden @ Wh                                          # (B, H)
    eproj = jnp.einsum('btk,kh->bth', encoder_outputs, We)       # (B, T, H)
    energy = jnp.tanh(eproj + hproj[:, None, :] + bias[None, :, :])
    scores = jnp.einsum('bth,h->bt', energy, v[:, 0])
    return jax.nn.softmax(scores, axis=1)


if __name__ == "__main__":
    B, T, H = 2, 8, 32

    key = jax.random.PRNGKey(0)
    k_hid, k_enc, k_w, k_b, k_v = jax.random.split(key, 5)

    hidden = jax.random.normal(k_hid, (B, H), dtype=jnp.float32)
    encoder_outputs = jax.random.normal(k_enc, (B, T, 2 * H), dtype=jnp.float32)

    # nn.Linear(3H, H): weight [H, 3H], bias [H]; use W^T = [3H, H] for x @ W^T.
    bound = 1.0 / jnp.sqrt(3.0 * H)
    W_t = jax.random.uniform(k_w, (3 * H, H), dtype=jnp.float32,
                             minval=-bound, maxval=bound)
    bias = jax.random.uniform(k_b, (1, H), dtype=jnp.float32,
                              minval=-bound, maxval=bound)
    Wh = W_t[:H, :]          # multiplies the repeated `hidden` (first H cat features)
    We = W_t[H:, :]          # multiplies `encoder_outputs` (last 2H cat features)

    # self.v = nn.Parameter(torch.rand(hidden_dim)) -> uniform [0, 1); column vector.
    v = jax.random.uniform(k_v, (H, 1), dtype=jnp.float32)

    ref = attention_reference(hidden, encoder_outputs, Wh, We, bias, v)

    # Exact f32 path: strict check against the pure-JAX reference.
    out_f32 = jax.block_until_ready(
        attention_forward(hidden, encoder_outputs, Wh, We, bias, v,
                          stream_dtype=None))
    assert out_f32.shape == (B, T)
    assert jnp.allclose(out_f32, ref, atol=1e-5, rtol=1e-5), "f32 mismatch vs reference"
    assert jnp.allclose(jnp.sum(out_f32, axis=1), 1.0, atol=1e-5)

    # Default path (bf16-streamed enc/We, f32 accumulation): looser tolerance.
    out_bf16 = jax.block_until_ready(
        attention_forward(hidden, encoder_outputs, Wh, We, bias, v))
    assert out_bf16.shape == (B, T)
    assert jnp.allclose(out_bf16, ref, atol=5e-2), "bf16-streamed mismatch vs reference"
    assert jnp.allclose(jnp.sum(out_bf16, axis=1), 1.0, atol=1e-3)

    print("KERNEL_OK")
</pallas_src>

<mosaic_0001>
module attributes {stable_mosaic.version = 11 : i64} {
  func.func @_attention_kernel(%arg0: i32, %arg1: memref<2x32xf32, #tpu.memory_space<vmem>>, %arg2: memref<2x128x64xf32, #tpu.memory_space<vmem>>, %arg3: memref<32x32xf32, #tpu.memory_space<vmem>>, %arg4: memref<64x32xf32, #tpu.memory_space<vmem>>, %arg5: memref<1x32xf32, #tpu.memory_space<vmem>>, %arg6: memref<32x1xf32, #tpu.memory_space<vmem>>, %arg7: memref<128x2xf32, #tpu.memory_space<vmem>>, %arg8: memref<2x32xf32, #tpu.memory_space<vmem>>) attributes {dimension_semantics = [#tpu.dimension_semantics<arbitrary>], iteration_bounds = array<i64: 1>, scalar_prefetch = 0 : i64, scratch_operands = 1 : i64, tpu.core_type = #tpu.core_type<tc>, window_params = [{pipeline_mode = #tpu.pipeline_mode<synchronous>, transform_indices = @transform_0, window_bounds = array<i64: 2, 32>}, {transform_indices = @transform_1, window_bounds = array<i64: 2, 128, 64>}, {pipeline_mode = #tpu.pipeline_mode<synchronous>, transform_indices = @transform_2, window_bounds = array<i64: 32, 32>}, {pipeline_mode = #tpu.pipeline_mode<synchronous>, transform_indices = @transform_3, window_bounds = array<i64: 64, 32>}, {pipeline_mode = #tpu.pipeline_mode<synchronous>, transform_indices = @transform_4, window_bounds = array<i64: 1, 32>}, {pipeline_mode = #tpu.pipeline_mode<synchronous>, transform_indices = @transform_5, window_bounds = array<i64: 32, 1>}, {pipeline_mode = #tpu.pipeline_mode<synchronous>, transform_indices = @transform_6, window_bounds = array<i64: 128, 2>}]} {
    %c0_i32 = arith.constant 0 : i32
    %0 = arith.cmpi eq, %arg0, %c0_i32 : i32
    %1 = arith.extui %0 : i1 to i32
    %c0_i32_0 = arith.constant 0 : i32
    %2 = arith.cmpi ne, %1, %c0_i32_0 : i32
    scf.if %2 {
      %c0_15 = arith.constant 0 : index
      %c0_16 = arith.constant 0 : index
      %28 = vector.load %arg1[%c0_15, %c0_16] : memref<2x32xf32, #tpu.memory_space<vmem>>, vector<2x32xf32>
      %c0_17 = arith.constant 0 : index
      %c0_18 = arith.constant 0 : index
      %29 = vector.load %arg3[%c0_17, %c0_18] : memref<32x32xf32, #tpu.memory_space<vmem>>, vector<32x32xf32>
      %cst_19 = arith.constant dense<0.000000e+00> : vector<2x32xf32>
      %30 = tpu.matmul %28, %29, %cst_19 {dimension_numbers = #tpu.dot_dimension_numbers<[1], [0], [0], [1], [0, 0, 1, 1], [], []>} : vector<2x32xf32>, vector<32x32xf32>, vector<2x32xf32> -> vector<2x32xf32>
      %c0_20 = arith.constant 0 : index
      %c0_21 = arith.constant 0 : index
      %31 = vector.load %arg5[%c0_20, %c0_21] : memref<1x32xf32, #tpu.memory_space<vmem>>, vector<1x32xf32>
      %32 = vector.broadcast %31 : vector<1x32xf32> to vector<2x32xf32>
      %33 = arith.addf %30, %32 : vector<2x32xf32>
      %c0_22 = arith.constant 0 : index
      %c0_23 = arith.constant 0 : index
      %34 = vector.load %arg8[%c0_22, %c0_23] : memref<2x32xf32, #tpu.memory_space<vmem>>, vector<2x32xf32>
      tpu.vector_store %arg8[%c0_22, %c0_23], %33 {strides = array<i32>} : memref<2x32xf32, #tpu.memory_space<vmem>>, vector<2x32xf32>,
    } else {
    }
    %c0 = arith.constant 0 : index
    %c0_1 = arith.constant 0 : index
    %c0_2 = arith.constant 0 : index
    %3 = vector.load %arg2[%c0, %c0_1, %c0_2] : memref<2x128x64xf32, #tpu.memory_space<vmem>>, vector<2x128x64xf32>
    %4 = vector.shape_cast %3 : vector<2x128x64xf32> to vector<256x64xf32>
    %c0_3 = arith.constant 0 : index
    %c0_4 = arith.constant 0 : index
    %5 = vector.load %arg4[%c0_3, %c0_4] : memref<64x32xf32, #tpu.memory_space<vmem>>, vector<64x32xf32>
    %cst = arith.constant dense<0.000000e+00> : vector<256x32xf32>
    %6 = tpu.matmul %4, %5, %cst {dimension_numbers = #tpu.dot_dimension_numbers<[1], [0], [0], [1], [0, 0, 1, 1], [], []>} : vector<256x64xf32>, vector<64x32xf32>, vector<256x32xf32> -> vector<256x32xf32>
    %c0_5 = arith.constant 0 : index
    %c0_6 = arith.constant 0 : index
    %7 = vector.load %arg6[%c0_5, %c0_6] : memref<32x1xf32, #tpu.memory_space<vmem>>, vector<32x1xf32>
    %c128_i32 = arith.constant 128 : i32
    %8 = arith.muli %arg0, %c128_i32 : i32
    %9 = tpu.assume_multiple %8, 128 : i32
    %10 = vector.extract_strided_slice %6 {offsets = [0, 0], sizes = [128, 32], strides = [1, 1]} : vector<256x32xf32> to vector<128x32xf32>
    %c0_7 = arith.constant 0 : index
    %c0_8 = arith.constant 0 : index
    %11 = vector.load %arg8[%c0_7, %c0_8] : memref<2x32xf32, #tpu.memory_space<vmem>>, vector<1x32xf32>
    %12 = vector.broadcast %11 : vector<1x32xf32> to vector<128x32xf32>
    %13 = arith.addf %10, %12 : vector<128x32xf32>
    %14 = math.tanh %13 : vector<128x32xf32>
    %cst_9 = arith.constant dense<0.000000e+00> : vector<128x1xf32>
    %15 = tpu.matmul %14, %7, %cst_9 {dimension_numbers = #tpu.dot_dimension_numbers<[1], [0], [0], [1], [0, 0, 1, 1], [], []>} : vector<128x32xf32>, vector<32x1xf32>, vector<128x1xf32> -> vector<128x1xf32>
    %16 = vector.extract_strided_slice %6 {offsets = [128, 0], sizes = [128, 32], strides = [1, 1]} : vector<256x32xf32> to vector<128x32xf32>
    %c1 = arith.constant 1 : index
    %c0_10 = arith.constant 0 : index
    %17 = vector.load %arg8[%c1, %c0_10] : memref<2x32xf32, #tpu.memory_space<vmem>>, vector<1x32xf32>
    %18 = vector.broadcast %17 : vector<1x32xf32> to vector<128x32xf32>
    %19 = arith.addf %16, %18 : vector<128x32xf32>
    %20 = math.tanh %19 : vector<128x32xf32>
    %cst_11 = arith.constant dense<0.000000e+00> : vector<128x1xf32>
    %21 = tpu.matmul %20, %7, %cst_11 {dimension_numbers = #tpu.dot_dimension_numbers<[1], [0], [0], [1], [0, 0, 1, 1], [], []>} : vector<128x32xf32>, vector<32x1xf32>, vector<128x1xf32> -> vector<128x1xf32>
    %22 = tpu.concatenate %15, %21 in 1 : vector<128x1xf32>, vector<128x1xf32> -> vector<128x2xf32>
    %23 = arith.index_cast %9 : i32 to index
    %c0_12 = arith.constant 0 : index
    %24 = vector.load %arg7[%23, %c0_12] : memref<128x2xf32, #tpu.memory_space<vmem>>, vector<128x2xf32>
    tpu.vector_store %arg7[%23, %c0_12], %22 {strides = array<i32>} : memref<128x2xf32, #tpu.memory_space<vmem>>, vector<128x2xf32>,
    %c0_i32_13 = arith.constant 0 : i32
    %25 = arith.cmpi eq, %arg0, %c0_i32_13 : i32
    %26 = arith.extui %25 : i1 to i32
    %c0_i32_14 = arith.constant 0 : i32
    %27 = arith.cmpi ne, %26, %c0_i32_14 : i32
    scf.if %27 {
      %c0_15 = arith.constant 0 : index
      %c0_16 = arith.constant 0 : index
      %28 = vector.load %arg7[%c0_15, %c0_16] : memref<128x2xf32, #tpu.memory_space<vmem>>, vector<128x2xf32>
      %29 = tpu.iota {dimensions = array<i32: 0>} : vector<128x2xi32>
      %c8_i32 = arith.constant 8 : i32
      %30 = vector.broadcast %c8_i32 : i32 to vector<128x2xi32>
      %31 = arith.cmpi slt, %29, %30 : vector<128x2xi32>
      %cst_17 = arith.constant 0xFF800000 : f32
      %32 = vector.broadcast %cst_17 : f32 to vector<128x2xf32>
      %33 = arith.select %31, %28, %32 : vector<128x2xi1>, vector<128x2xf32>
      %cst_18 = arith.constant dense<0xFF800000> : vector<2xf32>
      %34 = vector.multi_reduction <maximumf>, %33, %cst_18 [0] : vector<128x2xf32> to vector<2xf32>
      %35 = vector.shape_cast %34 : vector<2xf32> to vector<1x2xf32>
      %36 = vector.broadcast %35 : vector<1x2xf32> to vector<128x2xf32>
      %37 = arith.subf %33, %36 : vector<128x2xf32>
      %38 = math.exp %37 : vector<128x2xf32>
      %cst_19 = arith.constant dense<0.000000e+00> : vector<2xf32>
      %39 = vector.multi_reduction <add>, %38, %cst_19 [0] : vector<128x2xf32> to vector<2xf32>
      %40 = vector.shape_cast %39 : vector<2xf32> to vector<1x2xf32>
      %41 = vector.broadcast %40 : vector<1x2xf32> to vector<128x2xf32>
      %42 = arith.divf %38, %41 : vector<128x2xf32>
      %c0_20 = arith.constant 0 : index
      %c0_21 = arith.constant 0 : index
      %43 = vector.load %arg7[%c0_20, %c0_21] : memref<128x2xf32, #tpu.memory_space<vmem>>, vector<128x2xf32>
      tpu.vector_store %arg7[%c0_20, %c0_21], %42 {strides = array<i32>} : memref<128x2xf32, #tpu.memory_space<vmem>>, vector<128x2xf32>,
    } else {
    }
    return
  }
  func.func @transform_0(%arg0: i32) -> (i32, i32) {
    %c0_i32 = arith.constant 0 : i32
    %c0_i32_0 = arith.constant 0 : i32
    %c0_i32_1 = arith.constant 0 : i32
    return %c0_i32, %c0_i32_0 : i32, i32
  }
  func.func @transform_1(%arg0: i32) -> (i32, i32, i32) {
    %c0_i32 = arith.constant 0 : i32
    %c0_i32_0 = arith.constant 0 : i32
    %c0_i32_1 = arith.constant 0 : i32
    return %c0_i32, %arg0, %c0_i32_0 : i32, i32, i32
  }
  func.func @transform_2(%arg0: i32) -> (i32, i32) {
    %c0_i32 = arith.constant 0 : i32
    %c0_i32_0 = arith.constant 0 : i32
    %c0_i32_1 = arith.constant 0 : i32
    return %c0_i32, %c0_i32_0 : i32, i32
  }
  func.func @transform_3(%arg0: i32) -> (i32, i32) {
    %c0_i32 = arith.constant 0 : i32
    %c0_i32_0 = arith.constant 0 : i32
    %c0_i32_1 = arith.constant 0 : i32
    return %c0_i32, %c0_i32_0 : i32, i32
  }
  func.func @transform_4(%arg0: i32) -> (i32, i32) {
    %c0_i32 = arith.constant 0 : i32
    %c0_i32_0 = arith.constant 0 : i32
    %c0_i32_1 = arith.constant 0 : i32
    return %c0_i32, %c0_i32_0 : i32, i32
  }
  func.func @transform_5(%arg0: i32) -> (i32, i32) {
    %c0_i32 = arith.constant 0 : i32
    %c0_i32_0 = arith.constant 0 : i32
    %c0_i32_1 = arith.constant 0 : i32
    return %c0_i32, %c0_i32_0 : i32, i32
  }
  func.func @transform_6(%arg0: i32) -> (i32, i32) {
    %c0_i32 = arith.constant 0 : i32
    %c0_i32_0 = arith.constant 0 : i32
    %c0_i32_1 = arith.constant 0 : i32
    return %c0_i32, %c0_i32_0 : i32, i32
  }
}

</mosaic_0001>

<bundles_post_ra>
// kernel: tpu_custom_call.1
= control target key start
LH: loop header
LB: loop body
LE: loop exit
PB: predicated region body
PF: predicated region fallthrough
CT: control target
= control target key end

     0   :  { %v1673_v0 = vmov 0.0|0.0   ;;  %vm1674_vm0 = vmmov 0   ;;  %v1675_v4 = vmov 0.0   ;;  %vm155_vm1 = vcmask 523264   ;;  %s2146_s2 = inlined_call_operand.vmem [shape: f32[32,32], index: 2, kind: input, shape index: {}]   ;;  %s2147_s3 = inlined_call_operand.vmem [shape: f32[64,32], index: 3, kind: input, shape index: {}]   ;;  %s2148_s1 = inlined_call_operand.vmem [shape: f32[2,128,64], index: 1, kind: input, shape index: {}]   ;;  %s2149_s0 = inlined_call_operand.vmem [shape: f32[2,32], index: 0, kind: input, shape index: {}]   ;;  %s2150_s5 = inlined_call_operand.vmem [shape: f32[32,1], index: 5, kind: input, shape index: {}]   ;;  %s2151_s4 = inlined_call_operand.vmem [shape: f32[1,32], index: 4, kind: input, shape index: {}]   ;;  %s2152_s6 = inlined_call_operand.vmem [shape: f32[128,2], index: 6, kind: output, shape index: {}]  }
   0x1   :  { %1561 = vmatprep.subr.bf16.mxu0 %v1673_v0  ;;  %v28_v1 = vld [vmem:[%s2146_s2] sm:$0xff]  ;;  %v29_v2 = vld [vmem:[%s2146_s2 + $0x8] sm:$0xff]  ;;  %1430 = vmatprep.mubr.msk.f32.mxu0 %vm1674_vm0, %v1675_v4  ;;  %v30_v7 = vld [vmem:[%s2146_s2 + $0x10] sm:$0xff]  ;;  %vm39_vm2 = vcmask 261120   ;;  %vm113_vm3 = vcmask 254976   ;;  %vm1007_vm4 = vcmask 7168  }
   0x2   :  { %v147_v3 = vld [vmem:[%s2147_s3] sm:$0xff]  ;;  %v1562_v5 = vpack.c.bf16 %v29_v2, %v28_v1  ;;  %v148_v6 = vld [vmem:[%s2147_s3 + $0x8] sm:$0xff]  ;;  %v31_v8 = vld [vmem:[%s2146_s2 + $0x18] sm:$0xff]  ;;  %vm1025_vm5 = vcmask 15360  }
   0x3   :  { %v1567_v9 = vpack.c.bf16 %v148_v6, %v147_v3  ;;  %v149_v10 = vld [vmem:[%s2147_s3 + $0x10] sm:$0xff]  ;;  %v150_v11 = vld [vmem:[%s2147_s3 + $0x18] sm:$0xff]  ;;  %v1565_v12 = vpack.c.bf16 %v31_v8, %v30_v7  ;;  %v151_v14 = vld [vmem:[%s2147_s3 + $0x20] sm:$0xff] }
   0x4   :  { %1563 = vmatpush3.bf16.msra.mxu0 %v1562_v5  ;;  %v1571_v13 = vpack.c.bf16 %v150_v11, %v149_v10  ;;  %v152_v15 = vld [vmem:[%s2147_s3 + $0x28] sm:$0xff]  ;;  %v115_v16 = vld [vmem:[%s2148_s1] sm:$0xff]  ;;  %v153_v19 = vld [vmem:[%s2147_s3 + $0x30] sm:$0xff] }
   0x5   :  { %1568 = vmatprep.subr.bf16.mxu1 %v1567_v9  ;;  %1564 = vmatprep.subr.bf16.mxu0 %v1673_v0  ;;  %v1575_v17 = vpack.c.bf16 %v152_v15, %v151_v14  ;;  %v27_v18 = vld [vmem:[%s2149_s0] sm:$0x3]  ;;  %v154_v20 = vld [vmem:[%s2147_s3 + $0x38] sm:$0xff]  ;;  %v116_v22 = vld [vmem:[%s2148_s1 + $0x8] sm:$0xff] }
   0x6   :  { %1570 = vmatpush3.bf16.msra.mxu1 %v1567_v9  ;;  %1449 = vmatprep.mubr.msk.f32.mxu1 %vm155_vm1, %v115_v16  ;;  %v1579_v21 = vpack.c.bf16 %v154_v20, %v153_v19  ;;  %v117_v23 = vld [vmem:[%s2148_s1 + $0x10] sm:$0xff]  ;;  %v118_v24 = vld [vmem:[%s2148_s1 + $0x18] sm:$0xff]  ;;  %v119_v25 = vld [vmem:[%s2148_s1 + $0x20] sm:$0xff] }
   0x7   :  { %1572 = vmatprep.subr.bf16.mxu1 %v1571_v13  ;;  %v120_v26 = vld [vmem:[%s2148_s1 + $0x28] sm:$0xff]  ;;  %v121_v27 = vld [vmem:[%s2148_s1 + $0x30] sm:$0xff]  ;;  %v122_v28 = vld [vmem:[%s2148_s1 + $0x38] sm:$0xff] }
   0x8   :  { %1566 = vmatpush3.bf16.msra.mxu0 %v1565_v12  ;;  %v123_v29 = vld [vmem:[%s2148_s1 + $0x40] sm:$0xff]  ;;  %v124_v30 = vld [vmem:[%s2148_s1 + $0x48] sm:$0xff]  ;;  %v125_v31 = vld [vmem:[%s2148_s1 + $0x50] sm:$0xff] }
   0x9   :  { %v126_v32 = vld [vmem:[%s2148_s1 + $0x58] sm:$0xff]  ;;  %v127_v33 = vld [vmem:[%s2148_s1 + $0x60] sm:$0xff]  ;;  %v128_v34 = vld [vmem:[%s2148_s1 + $0x68] sm:$0xff] }
   0xa   :  { %1574 = vmatpush3.bf16.msra.mxu1 %v1571_v13  ;;  %v129_v35 = vld [vmem:[%s2148_s1 + $0x70] sm:$0xff]  ;;  %v130_v36 = vld [vmem:[%s2148_s1 + $0x78] sm:$0xff]  ;;  %v131_v37 = vld [vmem:[%s2148_s1 + $0x80] sm:$0xff] }
   0xb   :  { %1431 = vmatmul.mubr.msk.f32.vlgmr.msra.gmra.mrb[0].mxu0 %vm39_vm2, %v27_v18  ;;  %1576 = vmatprep.subr.bf16.mxu1 %v1575_v17  ;;  %v132_v38 = vld [vmem:[%s2148_s1 + $0x88] sm:$0xff]  ;;  %v133_v39 = vld [vmem:[%s2148_s1 + $0x90] sm:$0xff]  ;;  %v134_v40 = vld [vmem:[%s2148_s1 + $0x98] sm:$0xff] }
   0xc   :  { %v135_v41 = vld [vmem:[%s2148_s1 + $0xa0] sm:$0xff]  ;;  %v136_v42 = vld [vmem:[%s2148_s1 + $0xa8] sm:$0xff]  ;;  %v137_v43 = vld [vmem:[%s2148_s1 + $0xb0] sm:$0xff] }
   0xd   :  { %v138_v44 = vld [vmem:[%s2148_s1 + $0xb8] sm:$0xff]  ;;  %v139_v45 = vld [vmem:[%s2148_s1 + $0xc0] sm:$0xff]  ;;  %v140_v46 = vld [vmem:[%s2148_s1 + $0xc8] sm:$0xff] }
   0xe   :  { %1578 = vmatpush3.bf16.msra.mxu1 %v1575_v17  ;;  %v141_v47 = vld [vmem:[%s2148_s1 + $0xd0] sm:$0xff]  ;;  %v142_v48 = vld [vmem:[%s2148_s1 + $0xd8] sm:$0xff]  ;;  %v143_v49 = vld [vmem:[%s2148_s1 + $0xe0] sm:$0xff] }
   0xf   :  { %1580 = vmatprep.subr.bf16.mxu1 %v1579_v21  ;;  %v144_v50 = vld [vmem:[%s2148_s1 + $0xe8] sm:$0xff]  ;;  %v145_v51 = vld [vmem:[%s2148_s1 + $0xf0] sm:$0xff]  ;;  %v146_v52 = vld [vmem:[%s2148_s1 + $0xf8] sm:$0xff] }
  0x10   :  { %v477_v53 = vld [vmem:[%s2150_s5] sm:$0xff]  ;;  %v478_v54 = vld [vmem:[%s2150_s5 + $0x8] sm:$0xff]  ;;  %v479_v56 = vld [vmem:[%s2150_s5 + $0x10] sm:$0xff] }
  0x11   :  { %v1583_v55 = vpack.c.bf16 %v478_v54, %v477_v53  ;;  %v480_v57 = vld [vmem:[%s2150_s5 + $0x18] sm:$0xff]  ;;  %v1269_v59 = vld [vmem:[%s2151_s4] ss:$0 sm:$0xff]  ;;  %s1676_s4 = smov 1  }
  0x12   :  { %1582 = vmatpush3.bf16.msra.mxu1 %v1579_v21  ;;  %v1587_v58 = vpack.c.bf16 %v480_v57, %v479_v56 }
  0x13   :  { %1584 = vmatprep.subr.bf16.mxu0 %v1583_v55 }
  0x14   :  { %1586 = vmatpush3.bf16.msra.mxu0 %v1583_v55 }
  0x15   :  { %1450 = vmatmul.mubr.msk.f32.vlgmr.msra.gmra.mrb[0].mxu1 %vm155_vm1, %v116_v22  ;;  %1588 = vmatprep.subr.bf16.mxu0 %v1587_v58 }
  0x16   :  { %1452 = vmatprep.mubr.msk.f32.mxu1 %vm155_vm1, %v117_v23 }
  0x18   :  { %1590 = vmatpush3.bf16.msra.mxu0 %v1587_v58 }
  0x19   :  { %1453 = vmatmul.mubr.msk.f32.gmra.mrb[2].mxu1 %vm155_vm1, %v118_v24  ;;  %1592 = vmatprep.subr.bf16.mxu0 %v1583_v55 }
  0x1a   :  { %1455 = vmatprep.mubr.msk.f32.mxu1 %vm155_vm1, %v119_v25 }
  0x1d   :  { %1456 = vmatmul.mubr.msk.f32.gmra.mrb[4].mxu1 %vm155_vm1, %v120_v26 }
  0x1e   :  { %1458 = vmatprep.mubr.msk.f32.mxu1 %vm155_vm1, %v121_v27 }
  0x21   :  { %1459 = vmatmul.mubr.msk.f32.gmra.mrb[6].mxu1 %vm155_vm1, %v122_v28 }
  0x22   :  { %1461 = vmatprep.mubr.msk.f32.mxu1 %vm155_vm1, %v123_v29 }
  0x25   :  { %1462 = vmatmul.mubr.msk.f32.gmra.mrb[8].mxu1 %vm155_vm1, %v124_v30 }
  0x26   :  { %1464 = vmatprep.mubr.msk.f32.mxu1 %vm155_vm1, %v125_v31 }
  0x29   :  { %1465 = vmatmul.mubr.msk.f32.gmra.mrb[10].mxu1 %vm155_vm1, %v126_v32 }
  0x2a   :  { %1467 = vmatprep.mubr.msk.f32.mxu1 %vm155_vm1, %v127_v33 }
  0x2d   :  { %1468 = vmatmul.mubr.msk.f32.gmra.mrb[12].mxu1 %vm155_vm1, %v128_v34 }
  0x2e   :  { %1470 = vmatprep.mubr.msk.f32.mxu1 %vm155_vm1, %v129_v35 }
  0x31   :  { %1471 = vmatmul.mubr.msk.f32.gmra.mrb[14].mxu1 %vm155_vm1, %v130_v36 }
  0x32   :  { %1473 = vmatprep.mubr.msk.f32.mxu1 %vm155_vm1, %v131_v37 }
  0x35   :  { %1474 = vmatmul.mubr.msk.f32.gmra.mrb[16].mxu1 %vm155_vm1, %v132_v38 }
  0x36   :  { %1476 = vmatprep.mubr.msk.f32.mxu1 %vm155_vm1, %v133_v39 }
  0x39   :  { %1477 = vmatmul.mubr.msk.f32.gmra.mrb[18].mxu1 %vm155_vm1, %v134_v40 }
  0x3a   :  { %1479 = vmatprep.mubr.msk.f32.mxu1 %vm155_vm1, %v135_v41 }
  0x3d   :  { %1480 = vmatmul.mubr.msk.f32.gmra.mrb[20].mxu1 %vm155_vm1, %v136_v42 }
  0x3e   :  { %1482 = vmatprep.mubr.msk.f32.mxu1 %vm155_vm1, %v137_v43 }
  0x41   :  { %1483 = vmatmul.mubr.msk.f32.gmra.mrb[22].mxu1 %vm155_vm1, %v138_v44 }
  0x42   :  { %1485 = vmatprep.mubr.msk.f32.mxu1 %vm155_vm1, %v139_v45 }
  0x45   :  { %1486 = vmatmul.mubr.msk.f32.gmra.mrb[24].mxu1 %vm155_vm1, %v140_v46 }
  0x46   :  { %1488 = vmatprep.mubr.msk.f32.mxu1 %vm155_vm1, %v141_v47 }
  0x49   :  { %1489 = vmatmul.mubr.msk.f32.gmra.mrb[26].mxu1 %vm155_vm1, %v142_v48 }
  0x4a   :  { %1491 = vmatprep.mubr.msk.f32.mxu1 %vm155_vm1, %v143_v49 }
  0x4d   :  { %1492 = vmatmul.mubr.msk.f32.gmra.mrb[28].mxu1 %vm155_vm1, %v144_v50 }
  0x4e   :  { %1494 = vmatprep.mubr.msk.f32.mxu1 %vm155_vm1, %v145_v51 }
  0x51   :  { %1495 = vmatmul.mubr.msk.f32.gmra.mrb[30].mxu1 %vm155_vm1, %v146_v52 }
  0xde   :  { %v109_v60 = vpop.f32.mrb[0].mxu0 }
  0xdf   :  { %v110_v61 = vadd.f32 %v1269_v59, %v109_v60  ;;  %v1432_v62 = vpop.f32.mrb[1].mxu0 }
  0xe1   :  { %114 = vst.msk [vmem:[#allocation2] sm:$0x3] %vm113_vm3, %v110_v61 }
  0xe8   :  { %v1895_v63 = vld [vmem:[#allocation2] ss:$0 sm:$0xff]  ;;  %v1451_v0 = vpop.f32.mrb[0].mxu1  ;;  %v1922_v42 = vld [vmem:[#allocation2 + $0x1] ss:$0 sm:$0xff] }
  0xe9   :  { %v488_v1 = vadd.f32 %v1451_v0, %v1895_v63  ;;  %v318_v2 = vpop.f32.mrb[1].mxu1 }
  0xea   :  { %v487_v3 = vadd.f32 %v1895_v63, %v318_v2 }
  0xeb   :  { %1603 = vtanh.f32 %v488_v1 }
  0xec   :  { %1605 = vtanh.f32 %v487_v3  ;;  %v1454_v4 = vpop.f32.mrb[2].mxu1 }
  0xed   :  { %v490_v5 = vadd.f32 %v1454_v4, %v1895_v63  ;;  %v328_v6 = vpop.f32.mrb[3].mxu1 }
  0xee   :  { %v489_v7 = vadd.f32 %v1895_v63, %v328_v6 }
  0xf0   :  { %1607 = vtanh.f32 %v489_v7  ;;  %v1457_v8 = vpop.f32.mrb[4].mxu1 }
  0xf1   :  { %1609 = vtanh.f32 %v490_v5  ;;  %v492_v9 = vadd.f32 %v1457_v8, %v1895_v63  ;;  %v338_v10 = vpop.f32.mrb[5].mxu1 }
  0xf2   :  { %v491_v11 = vadd.f32 %v1895_v63, %v338_v10 }
  0xf4   :  { %1611 = vtanh.f32 %v491_v11  ;;  %v1460_v12 = vpop.f32.mrb[6].mxu1 }
  0xf5   :  { %v1604_v13 = vpop.eup %1603  ;;  %1613 = vtanh.f32 %v492_v9  ;;  %v494_v14 = vadd.f32 %v1460_v12, %v1895_v63  ;;  %v348_v15 = vpop.f32.mrb[7].mxu1 }
  0xf6   :  { %v1606_v16 = vpop.eup %1605  ;;  %v493_v17 = vadd.f32 %v1895_v63, %v348_v15 }
  0xf7   :  { %1505 = vmatprep.mubr.msk.f32.mxu0 %vm39_vm2, %v1606_v16 }
  0xf8   :  { %1615 = vtanh.f32 %v493_v17  ;;  %v1463_v18 = vpop.f32.mrb[8].mxu1  ;;  %1506 = vmatmul.mubr.msk.f32.vlgmr.msra.gmra.mrb[2].mxu0 %vm39_vm2, %v1604_v13 }
  0xf9   :  { %1617 = vtanh.f32 %v494_v14  ;;  %v496_v19 = vadd.f32 %v1463_v18, %v1895_v63  ;;  %1594 = vmatpush3.bf16.msra.mxu0 %v1583_v55  ;;  %v358_v20 = vpop.f32.mrb[9].mxu1 }
  0xfa   :  { %v1608_v21 = vpop.eup %1607  ;;  %v495_v22 = vadd.f32 %v1895_v63, %v358_v20  ;;  %1596 = vmatprep.subr.bf16.mxu0 %v1587_v58 }
  0xfb   :  { %v1610_v23 = vpop.eup %1609  ;;  %1508 = vmatprep.mubr.msk.f32.mxu0 %vm39_vm2, %v1608_v21 }
  0xfc   :  { %1619 = vtanh.f32 %v495_v22  ;;  %v1466_v24 = vpop.f32.mrb[10].mxu1  ;;  %1509 = vmatmul.mubr.msk.f32.gmra.mrb[4].mxu0 %vm39_vm2, %v1610_v23 }
  0xfd   :  { %1621 = vtanh.f32 %v496_v19  ;;  %v498_v25 = vadd.f32 %v1466_v24, %v1895_v63  ;;  %v368_v26 = vpop.f32.mrb[11].mxu1  ;;  %1598 = vmatpush3.bf16.msra.mxu0 %v1587_v58 }
  0xfe   :  { %v1612_v27 = vpop.eup %1611  ;;  %v497_v28 = vadd.f32 %v1895_v63, %v368_v26 }
  0xff   :  { %v1614_v29 = vpop.eup %1613  ;;  %1511 = vmatprep.mubr.msk.f32.mxu0 %vm39_vm2, %v1612_v27 }
 0x100   :  { %1623 = vtanh.f32 %v497_v28  ;;  %v1469_v30 = vpop.f32.mrb[12].mxu1  ;;  %1512 = vmatmul.mubr.msk.f32.gmra.mrb[6].mxu0 %vm39_vm2, %v1614_v29 }
 0x101   :  { %1625 = vtanh.f32 %v498_v25  ;;  %v500_v31 = vadd.f32 %v1469_v30, %v1895_v63  ;;  %v378_v32 = vpop.f32.mrb[13].mxu1 }
 0x102   :  { %v1616_v33 = vpop.eup %1615  ;;  %v499_v34 = vadd.f32 %v1895_v63, %v378_v32 }
 0x103   :  { %v1618_v35 = vpop.eup %1617  ;;  %1514 = vmatprep.mubr.msk.f32.mxu0 %vm39_vm2, %v1616_v33 }
 0x104   :  { %1627 = vtanh.f32 %v499_v34  ;;  %v1472_v36 = vpop.f32.mrb[14].mxu1  ;;  %1515 = vmatmul.mubr.msk.f32.gmra.mrb[8].mxu0 %vm39_vm2, %v1618_v35 }
 0x105   :  { %1629 = vtanh.f32 %v500_v31  ;;  %v502_v37 = vadd.f32 %v1472_v36, %v1895_v63  ;;  %v388_v38 = vpop.f32.mrb[15].mxu1 }
 0x106   :  { %v1620_v39 = vpop.eup %1619  ;;  %v501_v40 = vadd.f32 %v1895_v63, %v388_v38 }
 0x107   :  { %v1622_v41 = vpop.eup %1621  ;;  %1517 = vmatprep.mubr.msk.f32.mxu0 %vm39_vm2, %v1620_v39 }
 0x108   :  { %1631 = vtanh.f32 %v501_v40  ;;  %v1475_v43 = vpop.f32.mrb[16].mxu1  ;;  %1518 = vmatmul.mubr.msk.f32.gmra.mrb[10].mxu0 %vm39_vm2, %v1622_v41 }
 0x109   :  { %1633 = vtanh.f32 %v502_v37  ;;  %v719_v44 = vadd.f32 %v1475_v43, %v1922_v42  ;;  %v398_v45 = vpop.f32.mrb[17].mxu1 }
 0x10a   :  { %v1624_v46 = vpop.eup %1623  ;;  %v718_v47 = vadd.f32 %v1922_v42, %v398_v45 }
 0x10b   :  { %v1626_v48 = vpop.eup %1625  ;;  %1520 = vmatprep.mubr.msk.f32.mxu0 %vm39_vm2, %v1624_v46 }
 0x10c   :  { %1635 = vtanh.f32 %v718_v47  ;;  %v1478_v49 = vpop.f32.mrb[18].mxu1  ;;  %1521 = vmatmul.mubr.msk.f32.gmra.mrb[12].mxu0 %vm39_vm2, %v1626_v48 }
 0x10d   :  { %1637 = vtanh.f32 %v719_v44  ;;  %v721_v50 = vadd.f32 %v1478_v49, %v1922_v42  ;;  %v408_v51 = vpop.f32.mrb[19].mxu1 }
 0x10e   :  { %v1628_v52 = vpop.eup %1627  ;;  %v720_v53 = vadd.f32 %v1922_v42, %v408_v51 }
 0x10f   :  { %v1630_v54 = vpop.eup %1629  ;;  %1523 = vmatprep.mubr.msk.f32.mxu0 %vm39_vm2, %v1628_v52 }
 0x110   :  { %1639 = vtanh.f32 %v720_v53  ;;  %v1481_v55 = vpop.f32.mrb[20].mxu1  ;;  %1524 = vmatmul.mubr.msk.f32.gmra.mrb[14].mxu0 %vm39_vm2, %v1630_v54 }
 0x111   :  { %1641 = vtanh.f32 %v721_v50  ;;  %v723_v56 = vadd.f32 %v1481_v55, %v1922_v42  ;;  %v418_v57 = vpop.f32.mrb[21].mxu1 }
 0x112   :  { %v1632_v58 = vpop.eup %1631  ;;  %v722_v59 = vadd.f32 %v1922_v42, %v418_v57 }
 0x113   :  { %v1634_v60 = vpop.eup %1633  ;;  %1526 = vmatprep.mubr.msk.f32.mxu0 %vm39_vm2, %v1632_v58 }
 0x114   :  { %1643 = vtanh.f32 %v722_v59  ;;  %v1484_v61 = vpop.f32.mrb[22].mxu1  ;;  %1527 = vmatmul.mubr.msk.f32.gmra.mrb[16].mxu0 %vm39_vm2, %v1634_v60 }
 0x115   :  { %1645 = vtanh.f32 %v723_v56  ;;  %v725_v62 = vadd.f32 %v1484_v61, %v1922_v42  ;;  %v428_v63 = vpop.f32.mrb[23].mxu1 }
 0x116   :  { %v1636_v0 = vpop.eup %1635  ;;  %v724_v1 = vadd.f32 %v1922_v42, %v428_v63 }
 0x117   :  { %v1638_v2 = vpop.eup %1637  ;;  %1537 = vmatprep.mubr.msk.f32.mxu0 %vm39_vm2, %v1636_v0 }
 0x118   :  { %1647 = vtanh.f32 %v724_v1  ;;  %v1487_v3 = vpop.f32.mrb[24].mxu1  ;;  %1538 = vmatmul.mubr.msk.f32.vlgmr.msra.gmra.mrb[18].mxu0 %vm39_vm2, %v1638_v2 }
 0x119   :  { %1649 = vtanh.f32 %v725_v62  ;;  %v727_v4 = vadd.f32 %v1487_v3, %v1922_v42  ;;  %v438_v5 = vpop.f32.mrb[25].mxu1 }
 0x11a   :  { %v1640_v6 = vpop.eup %1639  ;;  %v726_v7 = vadd.f32 %v1922_v42, %v438_v5 }
 0x11b   :  { %v1642_v8 = vpop.eup %1641  ;;  %1540 = vmatprep.mubr.msk.f32.mxu0 %vm39_vm2, %v1640_v6 }
 0x11c   :  { %1651 = vtanh.f32 %v726_v7  ;;  %v1490_v9 = vpop.f32.mrb[26].mxu1  ;;  %1541 = vmatmul.mubr.msk.f32.gmra.mrb[20].mxu0 %vm39_vm2, %v1642_v8 }
 0x11d   :  { %1653 = vtanh.f32 %v727_v4  ;;  %v729_v10 = vadd.f32 %v1490_v9, %v1922_v42  ;;  %v448_v11 = vpop.f32.mrb[27].mxu1 }
 0x11e   :  { %v1644_v12 = vpop.eup %1643  ;;  %v728_v13 = vadd.f32 %v1922_v42, %v448_v11 }
 0x11f   :  { %v1646_v14 = vpop.eup %1645  ;;  %1543 = vmatprep.mubr.msk.f32.mxu0 %vm39_vm2, %v1644_v12 }
 0x120   :  { %1655 = vtanh.f32 %v728_v13  ;;  %v1493_v15 = vpop.f32.mrb[28].mxu1  ;;  %1544 = vmatmul.mubr.msk.f32.gmra.mrb[22].mxu0 %vm39_vm2, %v1646_v14 }
 0x121   :  { %1657 = vtanh.f32 %v729_v10  ;;  %v731_v16 = vadd.f32 %v1493_v15, %v1922_v42  ;;  %v458_v17 = vpop.f32.mrb[29].mxu1 }
 0x122   :  { %v1648_v18 = vpop.eup %1647  ;;  %v730_v19 = vadd.f32 %v1922_v42, %v458_v17 }
 0x123   :  { %v1650_v20 = vpop.eup %1649  ;;  %1546 = vmatprep.mubr.msk.f32.mxu0 %vm39_vm2, %v1648_v18 }
 0x124   :  { %1659 = vtanh.f32 %v730_v19  ;;  %v1496_v21 = vpop.f32.mrb[30].mxu1  ;;  %1547 = vmatmul.mubr.msk.f32.gmra.mrb[24].mxu0 %vm39_vm2, %v1650_v20 }
 0x125   :  { %1661 = vtanh.f32 %v731_v16  ;;  %v733_v22 = vadd.f32 %v1496_v21, %v1922_v42  ;;  %v468_v23 = vpop.f32.mrb[31].mxu1 }
 0x126   :  { %v1652_v24 = vpop.eup %1651  ;;  %v732_v25 = vadd.f32 %v1922_v42, %v468_v23 }
 0x127   :  { %v1654_v26 = vpop.eup %1653  ;;  %1549 = vmatprep.mubr.msk.f32.mxu0 %vm39_vm2, %v1652_v24 }
 0x128   :  { %1663 = vtanh.f32 %v732_v25  ;;  %1550 = vmatmul.mubr.msk.f32.gmra.mrb[26].mxu0 %vm39_vm2, %v1654_v26 }
 0x129   :  { %1665 = vtanh.f32 %v733_v22 }
 0x12a   :  { %v1656_v27 = vpop.eup %1655 }
 0x12b   :  { %v1658_v28 = vpop.eup %1657  ;;  %1552 = vmatprep.mubr.msk.f32.mxu0 %vm39_vm2, %v1656_v27 }
 0x12c   :  { %1553 = vmatmul.mubr.msk.f32.gmra.mrb[28].mxu0 %vm39_vm2, %v1658_v28 }
 0x12e   :  { %v1660_v29 = vpop.eup %1659 }
 0x12f   :  { %v1662_v30 = vpop.eup %1661  ;;  %1555 = vmatprep.mubr.msk.f32.mxu0 %vm39_vm2, %v1660_v29 }
 0x130   :  { %1556 = vmatmul.mubr.msk.f32.gmra.mrb[30].mxu0 %vm39_vm2, %v1662_v30 }
 0x132   :  { %v1664_v31 = vpop.eup %1663 }
 0x133   :  { %v1666_v32 = vpop.eup %1665  ;;  %1558 = vmatprep.mubr.msk.f32.mxu0 %vm39_vm2, %v1664_v31 }
 0x134   :  { %1559 = vmatmul.mubr.msk.f32.gmra.mrb[32].mxu0 %vm39_vm2, %v1666_v32 }
 0x1cb   :  { %v1507_v33 = vpop.f32.mrb[2].mxu0 }
 0x1cc   :  { %v634_v34 = vpop.f32.mrb[3].mxu0 }
 0x1cf   :  { %v1510_v35 = vpop.f32.mrb[4].mxu0 }
 0x1d0   :  { %v644_v36 = vpop.f32.mrb[5].mxu0 }
 0x1d3   :  { %v1963_v37 = vpop.f32.mrb[6].mxu0 }
 0x1d4   :  { %v654_v38 = vpop.f32.mrb[7].mxu0 }
 0x1d7   :  { %v1965_v39 = vpop.f32.mrb[8].mxu0 }
 0x1d8   :  { %v1967_v40 = vpop.f32.mrb[9].mxu0 }
 0x1db   :  { %v1969_v41 = vpop.f32.mrb[10].mxu0 }
 0x1dc   :  { %v1971_v42 = vpop.f32.mrb[11].mxu0 }
 0x1df   :  { %v1973_v43 = vpop.f32.mrb[12].mxu0 }
 0x1e0   :  { %v1975_v44 = vpop.f32.mrb[13].mxu0 }
 0x1e3   :  { %v1977_v45 = vpop.f32.mrb[14].mxu0 }
 0x1e4   :  { %v1979_v46 = vpop.f32.mrb[15].mxu0 }
 0x1e7   :  { %v1981_v47 = vpop.f32.mrb[16].mxu0 }
 0x1e8   :  { %v1983_v48 = vpop.f32.mrb[17].mxu0 }
 0x1eb   :  { %v1539_v49 = vpop.f32.mrb[18].mxu0 }
 0x1ec   :  { %v864_v50 = vpop.f32.mrb[19].mxu0 }
 0x1ed   :  { %959 = vrot.lane.b32.xlu0 %v864_v50, %s1676_s4 }
 0x1ef   :  { %v1542_v51 = vpop.f32.mrb[20].mxu0 }
 0x1f0   :  { %965 = vrot.lane.b32.xlu1 %v1542_v51, %s1676_s4  ;;  %v874_v52 = vpop.f32.mrb[21].mxu0 }
 0x1f1   :  { %961 = vrot.lane.b32.xlu0 %v1539_v49, %s1676_s4 }
 0x1f3   :  { %v1545_v53 = vpop.f32.mrb[22].mxu0 }
 0x1f4   :  { %963 = vrot.lane.b32.xlu1 %v874_v52, %s1676_s4  ;;  %v884_v54 = vpop.f32.mrb[23].mxu0 }
 0x1f5   :  { %967 = vrot.lane.b32.xlu0 %v884_v54, %s1676_s4 }
 0x1f7   :  { %v1548_v55 = vpop.f32.mrb[24].mxu0 }
 0x1f8   :  { %969 = vrot.lane.b32.xlu1 %v1545_v53, %s1676_s4  ;;  %v894_v56 = vpop.f32.mrb[25].mxu0 }
 0x1f9   :  { %971 = vrot.lane.b32.xlu0 %v894_v56, %s1676_s4 }
 0x1fb   :  { %v1551_v57 = vpop.f32.mrb[26].mxu0 }
 0x1fc   :  { %973 = vrot.lane.b32.xlu1 %v1548_v55, %s1676_s4  ;;  %v904_v58 = vpop.f32.mrb[27].mxu0 }
 0x1fd   :  { %975 = vrot.lane.b32.xlu0 %v904_v58, %s1676_s4 }
 0x1ff   :  { %v1554_v59 = vpop.f32.mrb[28].mxu0 }
 0x200   :  { %977 = vrot.lane.b32.xlu1 %v1551_v57, %s1676_s4  ;;  %v914_v60 = vpop.f32.mrb[29].mxu0 }
 0x201   :  { %979 = vrot.lane.b32.xlu0 %v914_v60, %s1676_s4 }
 0x203   :  { %v1557_v61 = vpop.f32.mrb[30].mxu0 }
 0x204   :  { %981 = vrot.lane.b32.xlu1 %v1554_v59, %s1676_s4  ;;  %v924_v62 = vpop.f32.mrb[31].mxu0 }
 0x205   :  { %983 = vrot.lane.b32.xlu0 %v924_v62, %s1676_s4 }
 0x207   :  { %v1560_v63 = vpop.f32.mrb[32].mxu0 }
 0x208   :  { %985 = vrot.lane.b32.xlu1 %v1557_v61, %s1676_s4  ;;  %v934_v0 = vpop.f32.mrb[33].mxu0 }
 0x209   :  { %987 = vrot.lane.b32.xlu0 %v934_v0, %s1676_s4 }
 0x20c   :  { %989 = vrot.lane.b32.xlu1 %v1560_v63, %s1676_s4 }
 0x25f   :  { %v960_v1 = vpop.permute.xlu0 %959 }
 0x260   :  { %v1008_v2 = vsel %vm1007_vm4, %v634_v34, %v960_v1 }
 0x261   :  { %1026 = vst.msk [vmem:[%s2152_s6] sm:$0xff] %vm1025_vm5, %v1008_v2 }
 0x262   :  { %v966_v3 = vpop.permute.xlu1 %965 }
 0x263   :  { %v1011_v4 = vsel %vm1007_vm4, %v1510_v35, %v966_v3  ;;  %v962_v5 = vpop.permute.xlu0 %961 }
 0x264   :  { %1029 = vst.msk [vmem:[%s2152_s6 + $0x18] sm:$0xff] %vm1025_vm5, %v1011_v4  ;;  %v1009_v6 = vsel %vm1007_vm4, %v1507_v33, %v962_v5 }
 0x265   :  { %1027 = vst.msk [vmem:[%s2152_s6 + $0x8] sm:$0xff] %vm1025_vm5, %v1009_v6 }
 0x266   :  { %v964_v7 = vpop.permute.xlu1 %963 }
 0x267   :  { %v1010_v8 = vsel %vm1007_vm4, %v644_v36, %v964_v7  ;;  %v968_v9 = vpop.permute.xlu0 %967 }
 0x268   :  { %v1045_v10 = vld [vmem:[%s2152_s6] sm:$0xff]  ;;  %1028 = vst.msk [vmem:[%s2152_s6 + $0x10] sm:$0xff] %vm1025_vm5, %v1010_v8  ;;  %v1012_v11 = vsel %vm1007_vm4, %v654_v38, %v968_v9 }
 0x269   :  { %v1110_v12 = vsel %vm1025_vm5, %v1045_v10, -inf  ;;  %1030 = vst.msk [vmem:[%s2152_s6 + $0x20] sm:$0xff] %vm1025_vm5, %v1012_v11 }
 0x26a   :  { %v1141_v13 = vrot.slane %v1110_v12, 4  ;;  %v970_v14 = vpop.permute.xlu1 %969 }
 0x26b   :  { %v1013_v15 = vsel %vm1007_vm4, %v1963_v37, %v970_v14  ;;  %v972_v16 = vpop.permute.xlu0 %971 }
 0x26c   :  { %v1142_v17 = vmax.f32 %v1110_v12, %v1141_v13  ;;  %1031 = vst.msk [vmem:[%s2152_s6 + $0x28] sm:$0xff] %vm1025_vm5, %v1013_v15  ;;  %v1014_v18 = vsel %vm1007_vm4, %v1967_v40, %v972_v16 }
 0x26d   :  { %1032 = vst.msk [vmem:[%s2152_s6 + $0x30] sm:$0xff] %vm1025_vm5, %v1014_v18 }
 0x26e   :  { %v1143_v19 = vrot.slane %v1142_v17, 2  ;;  %v974_v20 = vpop.permute.xlu1 %973 }
 0x26f   :  { %v1015_v21 = vsel %vm1007_vm4, %v1965_v39, %v974_v20  ;;  %v976_v22 = vpop.permute.xlu0 %975 }
 0x270   :  { %v1144_v23 = vmax.f32 %v1142_v17, %v1143_v19  ;;  %1033 = vst.msk [vmem:[%s2152_s6 + $0x38] sm:$0xff] %vm1025_vm5, %v1015_v21  ;;  %v1016_v24 = vsel %vm1007_vm4, %v1971_v42, %v976_v22 }
 0x271   :  { %1034 = vst.msk [vmem:[%s2152_s6 + $0x40] sm:$0xff] %vm1025_vm5, %v1016_v24 }
 0x272   :  { %v1145_v25 = vrot.slane %v1144_v23, 1  ;;  %v978_v26 = vpop.permute.xlu1 %977 }
 0x273   :  { %v1017_v27 = vsel %vm1007_vm4, %v1969_v41, %v978_v26  ;;  %v980_v28 = vpop.permute.xlu0 %979 }
 0x274   :  { %v1146_v29 = vmax.f32 %v1144_v23, %v1145_v25  ;;  %1035 = vst.msk [vmem:[%s2152_s6 + $0x48] sm:$0xff] %vm1025_vm5, %v1017_v27  ;;  %v1018_v30 = vsel %vm1007_vm4, %v1975_v44, %v980_v28 }
 0x275   :  { %1036 = vst.msk [vmem:[%s2152_s6 + $0x50] sm:$0xff] %vm1025_vm5, %v1018_v30 }
 0x276   :  { %v1147_v31 = vsub.f32 %v1045_v10, %v1146_v29  ;;  %v1148_v32 = vsub.f32 -inf, %v1146_v29  ;;  %v982_v33 = vpop.permute.xlu1 %981 }
 0x277   :  { %v1019_v34 = vsel %vm1007_vm4, %v1973_v43, %v982_v33  ;;  %v984_v35 = vpop.permute.xlu0 %983 }
 0x278   :  { %v1163_v36 = vmul.f32 1.442695, %v1147_v31  ;;  %v1165_v37 = vmul.f32 1.442695, %v1148_v32  ;;  %1037 = vst.msk [vmem:[%s2152_s6 + $0x58] sm:$0xff] %vm1025_vm5, %v1019_v34  ;;  %v1020_v38 = vsel %vm1007_vm4, %v1979_v46, %v984_v35 }
 0x279   :  { %1038 = vst.msk [vmem:[%s2152_s6 + $0x60] sm:$0xff] %vm1025_vm5, %v1020_v38 }
 0x27a   :  { %1667 = vpow2.f32 %v1163_v36  ;;  %v986_v39 = vpop.permute.xlu1 %985 }
 0x27b   :  { %1669 = vpow2.f32 %v1165_v37  ;;  %v1021_v40 = vsel %vm1007_vm4, %v1977_v45, %v986_v39  ;;  %v988_v41 = vpop.permute.xlu0 %987 }
 0x27c   :  { %1039 = vst.msk [vmem:[%s2152_s6 + $0x68] sm:$0xff] %vm1025_vm5, %v1021_v40  ;;  %v1022_v42 = vsel %vm1007_vm4, %v1983_v48, %v988_v41 }
 0x27d   :  { %1040 = vst.msk [vmem:[%s2152_s6 + $0x70] sm:$0xff] %vm1025_vm5, %v1022_v42 }
 0x27e   :  { %v990_v43 = vpop.permute.xlu1 %989 }
 0x27f   :  { %v1023_v44 = vsel %vm1007_vm4, %v1981_v47, %v990_v43 }
 0x280   :  { %1041 = vst.msk [vmem:[%s2152_s6 + $0x78] sm:$0xff] %vm1025_vm5, %v1023_v44 }
 0x284   :  { %v1668_v45 = vpop.eup %1667 }
 0x285   :  { %v1670_v46 = vpop.eup %1669  ;;  %v1195_v49 = vsel %vm1025_vm5, %v1668_v45, 0.0 }
 0x286   :  { %v1196_v48 = vsel %vm1025_vm5, %v1670_v46, 0.0 }
 0x287   :  { %v1197_v50 = vadd.f32 %v1196_v48, %v1195_v49 }
 0x289   :  { %v1199_v51 = vadd.f32 %v1197_v50, %v1196_v48 }
 0x28b   :  { %v1201_v52 = vadd.f32 %v1199_v51, %v1196_v48 }
 0x28d   :  { %v1203_v53 = vadd.f32 %v1201_v52, %v1196_v48 }
 0x28f   :  { %v1205_v54 = vadd.f32 %v1203_v53, %v1196_v48 }
 0x291   :  { %v1207_v55 = vadd.f32 %v1205_v54, %v1196_v48 }
 0x293   :  { %v1209_v56 = vadd.f32 %v1207_v55, %v1196_v48 }
 0x295   :  { %v1211_v57 = vadd.f32 %v1209_v56, %v1196_v48 }
 0x297   :  { %v1213_v47 = vadd.f32 %v1211_v57, %v1196_v48 }
 0x299   :  { %v1215_v58 = vadd.f32 %v1213_v47, %v1196_v48 }
 0x29b   :  { %v1217_v59 = vadd.f32 %v1215_v58, %v1196_v48 }
 0x29d   :  { %v1219_v60 = vadd.f32 %v1217_v59, %v1196_v48 }
 0x29f   :  { %v1221_v61 = vadd.f32 %v1219_v60, %v1196_v48 }
 0x2a1   :  { %v1223_v62 = vadd.f32 %v1221_v61, %v1196_v48 }
 0x2a3   :  { %v1225_v63 = vadd.f32 %v1223_v62, %v1196_v48 }
 0x2a5   :  { %v1226_v0 = vrot.slane %v1225_v63, 4 }
 0x2a7   :  { %v1227_v1 = vadd.f32 %v1226_v0, %v1225_v63 }
 0x2a9   :  { %v1228_v2 = vrot.slane %v1227_v1, 2 }
 0x2ab   :  { %v1229_v3 = vadd.f32 %v1228_v2, %v1227_v1 }
 0x2ad   :  { %v1230_v4 = vrot.slane %v1229_v3, 1 }
 0x2af   :  { %v1231_v5 = vadd.f32 %v1230_v4, %v1229_v3 }
 0x2b1   :  { %1671 = vrcp.f32 %v1231_v5 }
 0x2bb   :  { %v1672_v6 = vpop.eup %1671 }
 0x2bc   :  { %v1233_v7 = vmul.f32 %v1672_v6, %v1668_v45  ;;  %v1234_v8 = vmul.f32 %v1672_v6, %v1670_v46 }
 0x2be   :  { %1249 = vst.msk [vmem:[%s2152_s6] sm:$0xff] %vm1025_vm5, %v1233_v7  ;;  %1252 = vst.msk [vmem:[%s2152_s6 + $0x18] sm:$0xff] %vm1025_vm5, %v1234_v8 }
 0x2bf   :  { %1250 = vst.msk [vmem:[%s2152_s6 + $0x8] sm:$0xff] %vm1025_vm5, %v1234_v8  ;;  %1251 = vst.msk [vmem:[%s2152_s6 + $0x10] sm:$0xff] %vm1025_vm5, %v1234_v8 }
 0x2c0   :  { %1253 = vst.msk [vmem:[%s2152_s6 + $0x20] sm:$0xff] %vm1025_vm5, %v1234_v8  ;;  %1254 = vst.msk [vmem:[%s2152_s6 + $0x28] sm:$0xff] %vm1025_vm5, %v1234_v8 }
 0x2c1   :  { %1255 = vst.msk [vmem:[%s2152_s6 + $0x30] sm:$0xff] %vm1025_vm5, %v1234_v8  ;;  %1256 = vst.msk [vmem:[%s2152_s6 + $0x38] sm:$0xff] %vm1025_vm5, %v1234_v8 }
 0x2c2   :  { %1257 = vst.msk [vmem:[%s2152_s6 + $0x40] sm:$0xff] %vm1025_vm5, %v1234_v8  ;;  %1258 = vst.msk [vmem:[%s2152_s6 + $0x48] sm:$0xff] %vm1025_vm5, %v1234_v8 }
 0x2c3   :  { %1259 = vst.msk [vmem:[%s2152_s6 + $0x50] sm:$0xff] %vm1025_vm5, %v1234_v8  ;;  %1260 = vst.msk [vmem:[%s2152_s6 + $0x58] sm:$0xff] %vm1025_vm5, %v1234_v8 }
 0x2c4   :  { %1261 = vst.msk [vmem:[%s2152_s6 + $0x60] sm:$0xff] %vm1025_vm5, %v1234_v8  ;;  %1262 = vst.msk [vmem:[%s2152_s6 + $0x68] sm:$0xff] %vm1025_vm5, %v1234_v8 }
 0x2c5   :  { %1263 = vst.msk [vmem:[%s2152_s6 + $0x70] sm:$0xff] %vm1025_vm5, %v1234_v8  ;;  %1264 = vst.msk [vmem:[%s2152_s6 + $0x78] sm:$0xff] %vm1025_vm5, %v1234_v8 }

</bundles_post_ra>
